<compile_context>
chip_gen: v5e
topology: v5e:2x2
jax: 0.10.0
libtpu: 0.0.40
codegen_flags: <defaults>
</compile_context>

<pallas_src>
import jax
import jax.numpy as jnp
from jax.experimental import pallas as pl
from jax.experimental.pallas import tpu as pltpu

OUT_PAD = 128        # lane-dense padded output width
NEG_BIG = -1e30      # "minus infinity" for padded logit lanes (finite, f32-safe)


def mlp_kernel(x_ref, w1_ref, b1_ref, w2_ref, b2_ref, o_ref):
    # --- fc1 (bf16 MXU inputs, f32 accumulation) + ReLU (f32 VPU) ---
    x = x_ref[...].astype(jnp.bfloat16)
    h = jnp.dot(x, w1_ref[...], preferred_element_type=jnp.float32) + b1_ref[...]
    h = jnp.maximum(h, 0.0)

    # Dropout(p=0.5): identity in inference/eval mode.
    # TODO(synk): training-mode stochastic dropout (pltpu.prng_seed / prng_random_bits)
    #             is not emitted here; this is the forward-inference kernel.

    # --- fc2 (lane-dense: 128 output lanes; padded lanes carry a -1e30 bias) ---
    logits = jnp.dot(h.astype(jnp.bfloat16), w2_ref[...],
                     preferred_element_type=jnp.float32) + b2_ref[...]

    # --- stable softmax over last dim (padded lanes -> exp(..) == 0) ---
    m = jnp.max(logits, axis=-1, keepdims=True)
    e = jnp.exp(logits - m)
    denom = jnp.sum(e, axis=-1, keepdims=True)
    o_ref[...] = (e * pl.reciprocal(denom, approx=True)).astype(o_ref.dtype)


def mlp_forward(x, w1_bf16, b1, w2p_bf16, b2p, out_dim):
    B = x.shape[0]
    out_padded = pl.pallas_call(
        mlp_kernel,
        out_shape=jax.ShapeDtypeStruct((B, OUT_PAD), jnp.float32),
        in_specs=[pl.BlockSpec(memory_space=pltpu.MemorySpace.VMEM)] * 5,
        out_specs=pl.BlockSpec(memory_space=pltpu.MemorySpace.VMEM),
    )(x, w1_bf16, b1, w2p_bf16, b2p)
    # Padded lanes are exactly zero probability; slice back to the real class count.
    return out_padded[:, :out_dim]


def init_params(key, in_dim, hidden, out_dim):
    # Deterministic init mirroring nn.Linear: U(-1/sqrt(fan_in), 1/sqrt(fan_in)).
    k1, k2, k3, k4 = jax.random.split(key, 4)
    bound1 = 1.0 / (in_dim ** 0.5)
    bound2 = 1.0 / (hidden ** 0.5)
    w1 = jax.random.uniform(k1, (in_dim, hidden), jnp.float32, -bound1, bound1)
    b1 = jax.random.uniform(k2, (1, hidden), jnp.float32, -bound1, bound1)
    w2 = jax.random.uniform(k3, (hidden, out_dim), jnp.float32, -bound2, bound2)
    b2 = jax.random.uniform(k4, (1, out_dim), jnp.float32, -bound2, bound2)
    return w1, b1, w2, b2


def prepare_kernel_params(w1, b1, w2, b2, out_dim):
    """bf16 weights, f32 biases, fc2 padded to a lane-dense 128-wide output."""
    pad = OUT_PAD - out_dim
    w1_bf = w1.astype(jnp.bfloat16)
    w2p_bf = jnp.pad(w2, ((0, 0), (0, pad))).astype(jnp.bfloat16)           # zero weight cols
    b2p = jnp.pad(b2, ((0, 0), (0, pad)), constant_values=NEG_BIG)          # -inf-ish bias cols
    return w1_bf, b1, w2p_bf, b2p


if __name__ == "__main__":
    B, in_dim, hidden, out_dim = 8, 32, 1024, 10

    key = jax.random.PRNGKey(0)
    kx, kp = jax.random.split(key)
    x = jax.random.normal(kx, (B, in_dim), jnp.float32)
    w1, b1, w2, b2 = init_params(kp, in_dim, hidden, out_dim)
    w1_bf, b1, w2p_bf, b2p = prepare_kernel_params(w1, b1, w2, b2, out_dim)

    out = mlp_forward(x, w1_bf, b1, w2p_bf, b2p, out_dim)
    out = jax.block_until_ready(out)

    # Reference with the same bf16 quantization as the kernel (f32 accumulation).
    xq = x.astype(jnp.bfloat16).astype(jnp.float32)
    w1q = w1_bf.astype(jnp.float32)
    w2q = w2p_bf.astype(jnp.float32)[:, :out_dim]
    h_ref = jnp.maximum(xq @ w1q + b1, 0.0)
    hq = h_ref.astype(jnp.bfloat16).astype(jnp.float32)
    logits_ref = hq @ w2q + b2
    ref = jax.nn.softmax(logits_ref, axis=-1)

    assert out.shape == (B, out_dim)
    assert bool(jnp.all(jnp.isfinite(out)))
    assert jnp.allclose(jnp.sum(out, axis=-1), 1.0, atol=5e-3)
    assert jnp.allclose(out, ref, atol=2e-3)

    print("KERNEL_OK")
</pallas_src>

<mosaic_0001>
module attributes {stable_mosaic.version = 11 : i64} {
  func.func @mlp_kernel(%arg0: memref<8x32xf32, #tpu.memory_space<vmem>>, %arg1: memref<32x1024xbf16, #tpu.memory_space<vmem>>, %arg2: memref<1x1024xf32, #tpu.memory_space<vmem>>, %arg3: memref<1024x128xbf16, #tpu.memory_space<vmem>>, %arg4: memref<1x128xf32, #tpu.memory_space<vmem>>, %arg5: memref<8x128xf32, #tpu.memory_space<vmem>>) attributes {dimension_semantics = [], scalar_prefetch = 0 : i64, scratch_operands = 0 : i64, tpu.core_type = #tpu.core_type<tc>} {
    %c0 = arith.constant 0 : index
    %c0_0 = arith.constant 0 : index
    %0 = vector.load %arg0[%c0, %c0_0] : memref<8x32xf32, #tpu.memory_space<vmem>>, vector<8x32xf32>
    %1 = arith.truncf %0 : vector<8x32xf32> to vector<8x32xbf16>
    %c0_1 = arith.constant 0 : index
    %c0_2 = arith.constant 0 : index
    %2 = vector.load %arg1[%c0_1, %c0_2] : memref<32x1024xbf16, #tpu.memory_space<vmem>>, vector<32x1024xbf16>
    %cst = arith.constant dense<0.000000e+00> : vector<8x1024xf32>
    %3 = tpu.matmul %1, %2, %cst {dimension_numbers = #tpu.dot_dimension_numbers<[1], [0], [0], [1], [0, 0, 1, 1], [], []>} : vector<8x32xbf16>, vector<32x1024xbf16>, vector<8x1024xf32> -> vector<8x1024xf32>
    %c0_3 = arith.constant 0 : index
    %c0_4 = arith.constant 0 : index
    %4 = vector.load %arg2[%c0_3, %c0_4] : memref<1x1024xf32, #tpu.memory_space<vmem>>, vector<1x1024xf32>
    %5 = vector.broadcast %4 : vector<1x1024xf32> to vector<8x1024xf32>
    %6 = arith.addf %3, %5 : vector<8x1024xf32>
    %cst_5 = arith.constant 0.000000e+00 : f32
    %7 = vector.broadcast %cst_5 : f32 to vector<8x1024xf32>
    %8 = arith.maximumf %6, %7 : vector<8x1024xf32>
    %9 = arith.truncf %8 : vector<8x1024xf32> to vector<8x1024xbf16>
    %c0_6 = arith.constant 0 : index
    %c0_7 = arith.constant 0 : index
    %10 = vector.load %arg3[%c0_6, %c0_7] : memref<1024x128xbf16, #tpu.memory_space<vmem>>, vector<1024x128xbf16>
    %cst_8 = arith.constant dense<0.000000e+00> : vector<8x128xf32>
    %11 = tpu.matmul %9, %10, %cst_8 {dimension_numbers = #tpu.dot_dimension_numbers<[1], [0], [0], [1], [0, 0, 1, 1], [], []>} : vector<8x1024xbf16>, vector<1024x128xbf16>, vector<8x128xf32> -> vector<8x128xf32>
    %c0_9 = arith.constant 0 : index
    %c0_10 = arith.constant 0 : index
    %12 = vector.load %arg4[%c0_9, %c0_10] : memref<1x128xf32, #tpu.memory_space<vmem>>, vector<1x128xf32>
    %13 = vector.broadcast %12 : vector<1x128xf32> to vector<8x128xf32>
    %14 = arith.addf %11, %13 : vector<8x128xf32>
    %cst_11 = arith.constant dense<0xFF800000> : vector<8xf32>
    %15 = vector.multi_reduction <maximumf>, %14, %cst_11 [1] : vector<8x128xf32> to vector<8xf32>
    %16 = vector.shape_cast %15 : vector<8xf32> to vector<8x1xf32>
    %17 = vector.broadcast %16 : vector<8x1xf32> to vector<8x128xf32>
    %18 = arith.subf %14, %17 : vector<8x128xf32>
    %19 = math.exp %18 : vector<8x128xf32>
    %cst_12 = arith.constant dense<0.000000e+00> : vector<8xf32>
    %20 = vector.multi_reduction <add>, %19, %cst_12 [1] : vector<8x128xf32> to vector<8xf32>
    %21 = vector.shape_cast %20 : vector<8xf32> to vector<8x1xf32>
    %22 = tpu.reciprocal %21 {approx = true} : vector<8x1xf32> -> vector<8x1xf32>
    %23 = vector.broadcast %22 : vector<8x1xf32> to vector<8x128xf32>
    %24 = arith.mulf %19, %23 : vector<8x128xf32>
    %c0_13 = arith.constant 0 : index
    %c0_14 = arith.constant 0 : index
    %25 = vector.load %arg5[%c0_13, %c0_14] : memref<8x128xf32, #tpu.memory_space<vmem>>, vector<8x128xf32>
    tpu.vector_store %arg5[%c0_13, %c0_14], %24 {strides = array<i32>} : memref<8x128xf32, #tpu.memory_space<vmem>>, vector<8x128xf32>,
    return
  }
}

</mosaic_0001>

<bundles_post_ra>
// kernel: tpu_custom_call.1
= control target key start
LH: loop header
LB: loop body
LE: loop exit
PB: predicated region body
PF: predicated region fallthrough
CT: control target
= control target key end

     0   :  { %10 = vsyncpa [#allocation3], 0  ;;  %s1595_s0 = inlined_call_operand.hbm [shape: f32[8,32], index: 0, kind: input, shape index: {}]   ;;  %s1596_s1 = inlined_call_operand.hbm [shape: bf16[32,1024], index: 1, kind: input, shape index: {}]   ;;  %s1597_s2 = inlined_call_operand.hbm [shape: f32[1,1024], index: 2, kind: input, shape index: {}]   ;;  %s1598_s3 = inlined_call_operand.hbm [shape: bf16[1024,128], index: 3, kind: input, shape index: {}]   ;;  %s1599_s4 = inlined_call_operand.vmem [shape: f32[1,128], index: 4, kind: input, shape index: {}]   ;;  %s1600_s5 = inlined_call_operand.hbm [shape: f32[8,128], index: 5, kind: output, shape index: {}]  }
   0x1   :  { %11 = vsyncpa [#allocation6], 0 }
   0x2   :  { %12 = vsyncpa [#allocation9], 0  ;;  %s29_s20 = sshll.u32 %s1596_s1, 4  ;;  %s30_s20 = int_to_ptr.hbm [resolvable:$true] %s29_s20 }
   0x3   :  { %13 = vsyncpa [#allocation4], 0  ;;  %s1520_s21 = smov [#allocation5]   ;;  %s19_s25 = sshll.u32 %s1595_s0, 4  ;;  %s20_s25 = int_to_ptr.hbm [resolvable:$true] %s19_s25 }
   0x4   :  { %s31_s22 = sshll.u32 %s1520_s21, 4  ;;  %s1521_s26 = smov 512   ;;  %s32_s22 = int_to_ptr.vmem [resolvable:$true] %s31_s22 }
   0x5   :  { %s1522_s27 = smov 32   ;;  %s1523_s28 = smov [#allocation2]  }
   0x6   :  { %37 = dma.hbm_to_vmem [thread:$0]  %s30_s20, 2048, %s32_s22, [#allocation6], %s1521_s26, %s1521_s26, %s1522_s27  }
   0x7   :  { %s21_s29 = sshll.u32 %s1523_s28, 4  ;;  %s43_s7 = sshll.u32 %s1597_s2, 4  ;;  %s22_s29 = int_to_ptr.vmem [resolvable:$true] %s21_s29  ;;  %s44_s7 = int_to_ptr.hbm [resolvable:$true] %s43_s7 }
   0x8   :  { %24 = dma.hbm_to_vmem [thread:$0]  %s20_s25, 128, %s22_s29, [#allocation3]  }
   0x9   :  { %s53_s9 = sshll.u32 %s1598_s3, 4  ;;  %s1524_s10 = smov [#allocation7]   ;;  %s54_s9 = int_to_ptr.hbm [resolvable:$true] %s53_s9 }
   0xa   :  { %s45_s11 = sshll.u32 %s1524_s10, 4  ;;  %s1525_s0 = smov [#allocation8]   ;;  %s46_s11 = int_to_ptr.vmem [resolvable:$true] %s45_s11 }
   0xb   :  { %48 = dma.hbm_to_vmem [thread:$0]  %s44_s7, 128, %s46_s11, [#allocation6]  }
   0xc   :  { %s55_s12 = sshll.u32 %s1525_s0, 4  ;;  %s1526_s13 = smov 64   ;;  %s56_s12 = int_to_ptr.vmem [resolvable:$true] %s55_s12 }
   0xd   :  { %s1527_s14 = smov 4  }
   0xe   :  { %61 = dma.hbm_to_vmem [thread:$0]  %s54_s9, 8192, %s56_s12, [#allocation9], %s1526_s13, %s1526_s13, %s1527_s14  }
   0xf   :  { %1512 = dma.done.wait [#allocation3], 128  }
  0x10   :  { %1513 = vsyncadd [#allocation3], 4294967168 }
  0x11   :  { %1514 = dma.done.wait [#allocation6], 2176  }
  0x12   :  { %1515 = vsyncadd [#allocation6], 4294965120 }
  0x13   :  { %1516 = dma.done.wait [#allocation9], 8192  }
  0x14   :  { %1517 = vsyncadd [#allocation9], 4294959104  ;;  %v1004_v0 = vld [vmem:[#allocation5 + $0x40] sm:$0xf]  ;;  %v1012_v2 = vld [vmem:[#allocation5 + $0x48] sm:$0xf] }
  0x15   :  { %v1310_v1 = vld [vmem:[#allocation5 + $0x5c] sm:$0xf0]  ;;  %v1311_v4 = vld [vmem:[#allocation5 + $0x64] sm:$0xf0]  ;;  %v1307_v5 = vld [vmem:[#allocation5 + $0x4c] sm:$0xf] }
  0x16   :  { %v1005_v3 = vor.u32 %v1310_v1, %v1004_v0  ;;  %v1014_v6 = vld [vmem:[#allocation5 + $0x68] sm:$0xf0]  ;;  %v1013_v7 = vor.u32 %v1311_v4, %v1012_v2  ;;  %v1306_v9 = vld [vmem:[#allocation5 + $0x44] sm:$0xf]  ;;  %v972_v11 = vld [vmem:[#allocation5] sm:$0xf] }
  0x17   :  { %v1017_v8 = vor.u32 %v1307_v5, %v1014_v6  ;;  %v1006_v10 = vld [vmem:[#allocation5 + $0x60] sm:$0xf0]  ;;  %v1302_v13 = vld [vmem:[#allocation5 + $0x1c] sm:$0xf0]  ;;  %v980_v14 = vld [vmem:[#allocation5 + $0x8] sm:$0xf] }
  0x18   :  { %207 = vmatpush.bf16.msra.mxu0 %v1005_v3  ;;  %v1009_v12 = vor.u32 %v1306_v9, %v1006_v10  ;;  %v1303_v15 = vld [vmem:[#allocation5 + $0x24] sm:$0xf0]  ;;  %233 = vmatpush.bf16.msra.mxu2 %v1013_v7  ;;  %v973_v16 = vor.u32 %v1302_v13, %v972_v11  ;;  %v1299_v18 = vld [vmem:[#allocation5 + $0xc] sm:$0xf]  ;;  %v1298_v20 = vld [vmem:[#allocation5 + $0x4] sm:$0xf] }
  0x19   :  { %246 = vmatpush.bf16.msra.mxu3 %v1017_v8  ;;  %v981_v17 = vor.u32 %v1303_v15, %v980_v14  ;;  %v982_v19 = vld [vmem:[#allocation5 + $0x28] sm:$0xf0]  ;;  %v974_v22 = vld [vmem:[#allocation5 + $0x20] sm:$0xf0]  ;;  %v81_v23 = vld [vmem:[#allocation2] sm:$0xff]  ;;  %vm197_vm0 = vcmask 261120  }
  0x1a   :  { %220 = vmatpush.bf16.msra.mxu1 %v1009_v12  ;;  %v985_v21 = vor.u32 %v1299_v18, %v982_v19  ;;  %v1028_v24 = vld [vmem:[#allocation5 + $0x58] sm:$0xf]  ;;  %v977_v25 = vor.u32 %v1298_v20, %v974_v22  ;;  %v1571_v26 = vpack.c.bf16 %v81_v23, %v81_v23  ;;  %v1309_v28 = vld [vmem:[#allocation5 + $0x5c] sm:$0xf]  ;;  %v1020_v32 = vld [vmem:[#allocation5 + $0x50] sm:$0xf] }
  0x1b   :  { %v1313_v27 = vld [vmem:[#allocation5 + $0x74] sm:$0xf0]  ;;  %v1030_v29 = vld [vmem:[#allocation5 + $0x78] sm:$0xf0]  ;;  %v1312_v33 = vld [vmem:[#allocation5 + $0x6c] sm:$0xf0] }
  0x1c   :  { %208 = vmatpush.bf16.msra.mxu0 %v973_v16  ;;  %v1029_v30 = vor.u32 %v1313_v27, %v1028_v24  ;;  %v1033_v31 = vor.u32 %v1309_v28, %v1030_v29  ;;  %v996_v34 = vld [vmem:[#allocation5 + $0x18] sm:$0xf]  ;;  %234 = vmatpush.bf16.msra.mxu2 %v981_v17  ;;  %v1021_v35 = vor.u32 %v1312_v33, %v1020_v32  ;;  %v1308_v37 = vld [vmem:[#allocation5 + $0x54] sm:$0xf]  ;;  %v1301_v41 = vld [vmem:[#allocation5 + $0x1c] sm:$0xf] }
  0x1d   :  { %247 = vmatpush.bf16.msra.mxu3 %v985_v21  ;;  %v1305_v36 = vld [vmem:[#allocation5 + $0x34] sm:$0xf0]  ;;  %v1022_v38 = vld [vmem:[#allocation5 + $0x70] sm:$0xf0]  ;;  %v998_v42 = vld [vmem:[#allocation5 + $0x38] sm:$0xf0] }
  0x1e   :  { %221 = vmatpush.bf16.msra.mxu1 %v977_v25  ;;  %v997_v39 = vor.u32 %v1305_v36, %v996_v34  ;;  %v1025_v40 = vor.u32 %v1308_v37, %v1022_v38  ;;  %v988_v43 = vld [vmem:[#allocation5 + $0x10] sm:$0xf]  ;;  %v1001_v44 = vor.u32 %v1301_v41, %v998_v42  ;;  %v1300_v46 = vld [vmem:[#allocation5 + $0x14] sm:$0xf]  ;;  %v1337_v49 = vld [vmem:[#allocation8 + $0xb8] sm:$0xff]  ;;  %s958_s18 = sshll.u32 %s1600_s5, 4  ;;  %s959_s18 = int_to_ptr.hbm [resolvable:$true] %s958_s18 }
  0x1f   :  { %1034 = vmatmul.msk.bf16.vlgmr.msra.gmra.mxu0 %vm197_vm0, %v1571_v26  ;;  %v1304_v45 = vld [vmem:[#allocation5 + $0x2c] sm:$0xf0]  ;;  %v990_v47 = vld [vmem:[#allocation5 + $0x30] sm:$0xf0]  ;;  %1036 = vmatmul.msk.bf16.vlgmr.msra.gmra.mxu2 %vm197_vm0, %v1571_v26  ;;  %v1345_v50 = vld [vmem:[#allocation8 + $0xf8] sm:$0xff] }
  0x20   :  { %285 = vmatpush.bf16.msrb.mxu2 %v1029_v30  ;;  %1037 = vmatmul.msk.bf16.vlgmr.msra.gmra.mxu3 %vm197_vm0, %v1571_v26  ;;  %v989_v48 = vor.u32 %v1304_v45, %v988_v43  ;;  %v993_v51 = vor.u32 %v1300_v46, %v990_v47  ;;  %v1321_v52 = vld [vmem:[#allocation8 + $0x38] sm:$0xff]  ;;  %v1336_v54 = vld [vmem:[#allocation8 + $0xb0] sm:$0xff]  ;;  %v1335_v58 = vld [vmem:[#allocation8 + $0xa8] sm:$0xff] }
  0x21   :  { %298 = vmatpush.bf16.msrb.mxu3 %v1033_v31  ;;  %1035 = vmatmul.msk.bf16.vlgmr.msra.gmra.mxu1 %vm197_vm0, %v1571_v26  ;;  %v1329_v53 = vld [vmem:[#allocation8 + $0x78] sm:$0xff]  ;;  %v1344_v55 = vld [vmem:[#allocation8 + $0xf0] sm:$0xff]  ;;  %v1343_v59 = vld [vmem:[#allocation8 + $0xe8] sm:$0xff] }
  0x22   :  { %259 = vmatpush.bf16.msrb.mxu0 %v1021_v35  ;;  %272 = vmatpush.bf16.msrb.mxu1 %v1025_v40  ;;  %v1320_v56 = vld [vmem:[#allocation8 + $0x30] sm:$0xff]  ;;  %v1319_v60 = vld [vmem:[#allocation8 + $0x28] sm:$0xff]  ;;  %v1334_v62 = vld [vmem:[#allocation8 + $0xa0] sm:$0xff] }
  0x23   :  { %v1328_v57 = vld [vmem:[#allocation8 + $0x70] sm:$0xff]  ;;  %v1327_v61 = vld [vmem:[#allocation8 + $0x68] sm:$0xff]  ;;  %v1318_v63 = vld [vmem:[#allocation8 + $0x20] sm:$0xff] }
  0x24   :  { %286 = vmatpush.bf16.msrb.mxu2 %v997_v39  ;;  %v1342_v0 = vld [vmem:[#allocation8 + $0xe0] sm:$0xff]  ;;  %v1333_v2 = vld [vmem:[#allocation8 + $0x98] sm:$0xff]  ;;  %v1332_v6 = vld [vmem:[#allocation8 + $0x90] sm:$0xff] }
  0x25   :  { %299 = vmatpush.bf16.msrb.mxu3 %v1001_v44  ;;  %v1326_v1 = vld [vmem:[#allocation8 + $0x60] sm:$0xff]  ;;  %v1317_v3 = vld [vmem:[#allocation8 + $0x18] sm:$0xff]  ;;  %v1316_v7 = vld [vmem:[#allocation8 + $0x10] sm:$0xff] }
  0x26   :  { %260 = vmatpush.bf16.msrb.mxu0 %v989_v48  ;;  %273 = vmatpush.bf16.msrb.mxu1 %v993_v51  ;;  %v1341_v4 = vld [vmem:[#allocation8 + $0xd8] sm:$0xff]  ;;  %v1340_v8 = vld [vmem:[#allocation8 + $0xd0] sm:$0xff]  ;;  %v1331_v10 = vld [vmem:[#allocation8 + $0x88] sm:$0xff] }
  0x27   :  { %v1325_v5 = vld [vmem:[#allocation8 + $0x58] sm:$0xff]  ;;  %v1324_v9 = vld [vmem:[#allocation8 + $0x50] sm:$0xff]  ;;  %v1315_v11 = vld [vmem:[#allocation8 + $0x8] sm:$0xff] }
  0x28   :  { %863 = vmatpush.bf16.msra.mxu2 %v1337_v49  ;;  %v1339_v12 = vld [vmem:[#allocation8 + $0xc8] sm:$0xff]  ;;  %v1330_v14 = vld [vmem:[#allocation8 + $0x80] sm:$0xff]  ;;  %v1353_v17 = vld [vmem:[#allocation8 + $0x138] sm:$0xff] }
  0x29   :  { %876 = vmatpush.bf16.msra.mxu3 %v1345_v50  ;;  %v1323_v13 = vld [vmem:[#allocation8 + $0x48] sm:$0xff]  ;;  %v1314_v15 = vld [vmem:[#allocation8] sm:$0xff]  ;;  %v1361_v19 = vld [vmem:[#allocation8 + $0x178] sm:$0xff] }
  0x2a   :  { %837 = vmatpush.bf16.msra.mxu0 %v1321_v52  ;;  %850 = vmatpush.bf16.msra.mxu1 %v1329_v53  ;;  %v1338_v16 = vld [vmem:[#allocation8 + $0xc0] sm:$0xff]  ;;  %v1369_v20 = vld [vmem:[#allocation8 + $0x1b8] sm:$0xff]  ;;  %v1352_v22 = vld [vmem:[#allocation8 + $0x130] sm:$0xff] }
  0x2b   :  { %v1322_v18 = vld [vmem:[#allocation8 + $0x40] sm:$0xff]  ;;  %v1377_v21 = vld [vmem:[#allocation8 + $0x1f8] sm:$0xff]  ;;  %v1360_v23 = vld [vmem:[#allocation8 + $0x170] sm:$0xff] }
  0x2c   :  { %864 = vmatpush.bf16.msra.mxu2 %v1336_v54  ;;  %v1351_v24 = vld [vmem:[#allocation8 + $0x128] sm:$0xff]  ;;  %v1376_v27 = vld [vmem:[#allocation8 + $0x1f0] sm:$0xff]  ;;  %v1350_v28 = vld [vmem:[#allocation8 + $0x120] sm:$0xff] }
  0x2d   :  { %877 = vmatpush.bf16.msra.mxu3 %v1344_v55  ;;  %v1359_v25 = vld [vmem:[#allocation8 + $0x168] sm:$0xff]  ;;  %v1358_v29 = vld [vmem:[#allocation8 + $0x160] sm:$0xff]  ;;  %v1349_v32 = vld [vmem:[#allocation8 + $0x118] sm:$0xff] }
  0x2e   :  { %838 = vmatpush.bf16.msra.mxu0 %v1320_v56  ;;  %851 = vmatpush.bf16.msra.mxu1 %v1328_v57  ;;  %v1367_v30 = vld [vmem:[#allocation8 + $0x1a8] sm:$0xff]  ;;  %v1357_v33 = vld [vmem:[#allocation8 + $0x158] sm:$0xff]  ;;  %v1366_v34 = vld [vmem:[#allocation8 + $0x1a0] sm:$0xff] }
  0x2f   :  { %1038 = vmatmul.msk.bf16.vlgmr.msrb.gmra.mxu0 %vm197_vm0, %v1571_v26  ;;  %1040 = vmatmul.msk.bf16.vlgmr.msrb.gmra.mxu2 %vm197_vm0, %v1571_v26  ;;  %v1375_v31 = vld [vmem:[#allocation8 + $0x1e8] sm:$0xff]  ;;  %v1374_v35 = vld [vmem:[#allocation8 + $0x1e0] sm:$0xff]  ;;  %v1348_v36 = vld [vmem:[#allocation8 + $0x110] sm:$0xff] }
  0x30   :  { %865 = vmatpush.bf16.msra.mxu2 %v1335_v58  ;;  %1041 = vmatmul.msk.bf16.vlgmr.msrb.gmra.mxu3 %vm197_vm0, %v1571_v26  ;;  %v1356_v37 = vld [vmem:[#allocation8 + $0x150] sm:$0xff]  ;;  %v1365_v38 = vld [vmem:[#allocation8 + $0x198] sm:$0xff]  ;;  %v1347_v40 = vld [vmem:[#allocation8 + $0x108] sm:$0xff] }
  0x31   :  { %878 = vmatpush.bf16.msra.mxu3 %v1343_v59  ;;  %1039 = vmatmul.msk.bf16.vlgmr.msrb.gmra.mxu1 %vm197_vm0, %v1571_v26  ;;  %v1368_v26 = vld [vmem:[#allocation8 + $0x1b0] sm:$0xff]  ;;  %v1373_v39 = vld [vmem:[#allocation8 + $0x1d8] sm:$0xff]  ;;  %v1355_v41 = vld [vmem:[#allocation8 + $0x148] sm:$0xff] }
  0x32   :  { %839 = vmatpush.bf16.msra.mxu0 %v1319_v60  ;;  %852 = vmatpush.bf16.msra.mxu1 %v1327_v61  ;;  %v1364_v42 = vld [vmem:[#allocation8 + $0x190] sm:$0xff]  ;;  %v1346_v44 = vld [vmem:[#allocation8 + $0x100] sm:$0xff]  ;;  %v1363_v46 = vld [vmem:[#allocation8 + $0x188] sm:$0xff] }
  0x33   :  { %v1372_v43 = vld [vmem:[#allocation8 + $0x1d0] sm:$0xff]  ;;  %v1354_v45 = vld [vmem:[#allocation8 + $0x140] sm:$0xff]  ;;  %v1371_v47 = vld [vmem:[#allocation8 + $0x1c8] sm:$0xff] }
  0x34   :  { %866 = vmatpush.bf16.msra.mxu2 %v1334_v62  ;;  %v1362_v48 = vld [vmem:[#allocation8 + $0x180] sm:$0xff]  ;;  %v99_v50 = vld [vmem:[#allocation7] sm:$0xff] }
  0x35   :  { %879 = vmatpush.bf16.msra.mxu3 %v1342_v0  ;;  %v1370_v49 = vld [vmem:[#allocation8 + $0x1c0] sm:$0xff]  ;;  %v101_v51 = vperm.slane %v99_v50, 0  ;;  %v102_v52 = vperm.slane %v99_v50, 1  ;;  %v103_v58 = vperm.slane %v99_v50, 2  ;;  %v104_v59 = vperm.slane %v99_v50, 3 }
  0x36   :  { %840 = vmatpush.bf16.msra.mxu0 %v1318_v63  ;;  %853 = vmatpush.bf16.msra.mxu1 %v1326_v1 }
  0x38   :  { %867 = vmatpush.bf16.msra.mxu2 %v1333_v2 }
  0x39   :  { %880 = vmatpush.bf16.msra.mxu3 %v1341_v4 }
  0x3a   :  { %841 = vmatpush.bf16.msra.mxu0 %v1317_v3  ;;  %854 = vmatpush.bf16.msra.mxu1 %v1325_v5 }
  0x3c   :  { %868 = vmatpush.bf16.msra.mxu2 %v1332_v6 }
  0x3d   :  { %881 = vmatpush.bf16.msra.mxu3 %v1340_v8 }
  0x3e   :  { %842 = vmatpush.bf16.msra.mxu0 %v1316_v7  ;;  %855 = vmatpush.bf16.msra.mxu1 %v1324_v9  ;;  %v105_v9 = vperm.slane %v99_v50, 4 }
  0x40   :  { %869 = vmatpush.bf16.msra.mxu2 %v1331_v10 }
  0x41   :  { %882 = vmatpush.bf16.msra.mxu3 %v1339_v12  ;;  %v106_v12 = vperm.slane %v99_v50, 5 }
  0x42   :  { %843 = vmatpush.bf16.msra.mxu0 %v1315_v11  ;;  %856 = vmatpush.bf16.msra.mxu1 %v1323_v13 }
  0x44   :  { %870 = vmatpush.bf16.msra.mxu2 %v1330_v14 }
  0x45   :  { %883 = vmatpush.bf16.msra.mxu3 %v1338_v16 }
  0x46   :  { %844 = vmatpush.bf16.msra.mxu0 %v1314_v15  ;;  %857 = vmatpush.bf16.msra.mxu1 %v1322_v18  ;;  %v107_v18 = vperm.slane %v99_v50, 6 }
  0x48   :  { %915 = vmatpush.bf16.msrb.mxu2 %v1369_v20 }
  0x49   :  { %928 = vmatpush.bf16.msrb.mxu3 %v1377_v21 }
  0x4a   :  { %889 = vmatpush.bf16.msrb.mxu0 %v1353_v17  ;;  %902 = vmatpush.bf16.msrb.mxu1 %v1361_v19  ;;  %v108_v19 = vperm.slane %v99_v50, 7 }
  0x4c   :  { %916 = vmatpush.bf16.msrb.mxu2 %v1368_v26 }
  0x4d   :  { %929 = vmatpush.bf16.msrb.mxu3 %v1376_v27 }
  0x4e   :  { %890 = vmatpush.bf16.msrb.mxu0 %v1352_v22  ;;  %903 = vmatpush.bf16.msrb.mxu1 %v1360_v23 }
  0x50   :  { %917 = vmatpush.bf16.msrb.mxu2 %v1367_v30 }
  0x51   :  { %930 = vmatpush.bf16.msrb.mxu3 %v1375_v31 }
  0x52   :  { %891 = vmatpush.bf16.msrb.mxu0 %v1351_v24  ;;  %904 = vmatpush.bf16.msrb.mxu1 %v1359_v25 }
  0x54   :  { %918 = vmatpush.bf16.msrb.mxu2 %v1366_v34 }
  0x55   :  { %931 = vmatpush.bf16.msrb.mxu3 %v1374_v35 }
  0x56   :  { %892 = vmatpush.bf16.msrb.mxu0 %v1350_v28  ;;  %905 = vmatpush.bf16.msrb.mxu1 %v1358_v29 }
  0x58   :  { %919 = vmatpush.bf16.msrb.mxu2 %v1365_v38 }
  0x59   :  { %932 = vmatpush.bf16.msrb.mxu3 %v1373_v39 }
  0x5a   :  { %893 = vmatpush.bf16.msrb.mxu0 %v1349_v32  ;;  %906 = vmatpush.bf16.msrb.mxu1 %v1357_v33 }
  0x5c   :  { %920 = vmatpush.bf16.msrb.mxu2 %v1364_v42 }
  0x5d   :  { %933 = vmatpush.bf16.msrb.mxu3 %v1372_v43 }
  0x5e   :  { %894 = vmatpush.bf16.msrb.mxu0 %v1348_v36  ;;  %907 = vmatpush.bf16.msrb.mxu1 %v1356_v37  ;;  %v1387_v37 = vld [vmem:[%s1599_s4] ss:$0 sm:$0xff]  ;;  %s1528_s4 = smov [#allocation10]  }
  0x5f   :  { %s956_s15 = sshll.u32 %s1528_s4, 4  ;;  %s957_s15 = int_to_ptr.vmem [resolvable:$true] %s956_s15 }
  0x60   :  { %921 = vmatpush.bf16.msrb.mxu2 %v1363_v46 }
  0x61   :  { %934 = vmatpush.bf16.msrb.mxu3 %v1371_v47 }
  0x62   :  { %895 = vmatpush.bf16.msrb.mxu0 %v1347_v40  ;;  %908 = vmatpush.bf16.msrb.mxu1 %v1355_v41 }
  0x64   :  { %922 = vmatpush.bf16.msrb.mxu2 %v1362_v48 }
  0x65   :  { %935 = vmatpush.bf16.msrb.mxu3 %v1370_v49 }
  0x66   :  { %896 = vmatpush.bf16.msrb.mxu0 %v1346_v44  ;;  %909 = vmatpush.bf16.msrb.mxu1 %v1354_v45 }
  0x9c   :  { %v210_v53 = vpop.f32.mrf.mxu0 }
  0x9d   :  { %v211_v54 = vadd.f32 %v210_v53, %v101_v51 }
  0x9e   :  { %v223_v55 = vpop.f32.mrf.mxu1 }
  0x9f   :  { %v305_v56 = vmax.f32 %v211_v54, 0.0  ;;  %v224_v57 = vadd.f32 %v223_v55, %v102_v52 }
  0xa1   :  { %v313_v60 = vpack.c.bf16 %v305_v56, %v305_v56  ;;  %v306_v61 = vmax.f32 %v224_v57, 0.0 }
  0xa2   :  { %v236_v63 = vpop.f32.mrf.mxu2 }
  0xa3   :  { %v314_v62 = vpack.c.bf16 %v306_v61, %v306_v61  ;;  %v249_v0 = vpop.f32.mrf.mxu3  ;;  %845 = vmatmul.bf16.vlgmr.msra.gmra.mxu0 %v313_v60  ;;  %v237_v1 = vadd.f32 %v236_v63, %v103_v58 }
  0xa4   :  { %v250_v2 = vadd.f32 %v249_v0, %v104_v59  ;;  %v212_v3 = vpop.f32.mrf.mxu0 }
  0xa5   :  { %858 = vmatmul.bf16.vlgmr.msra.gmra.mxu1 %v314_v62  ;;  %v307_v4 = vmax.f32 %v237_v1, 0.0 }
  0xa6   :  { %v308_v5 = vmax.f32 %v250_v2, 0.0  ;;  %v225_v6 = vpop.f32.mrf.mxu1 }
  0xa7   :  { %v315_v7 = vpack.c.bf16 %v307_v4, %v307_v4 }
  0xa8   :  { %v316_v8 = vpack.c.bf16 %v308_v5, %v308_v5 }
  0xa9   :  { %871 = vmatmul.bf16.vlgmr.msra.gmra.mxu2 %v315_v7 }
  0xaa   :  { %884 = vmatmul.bf16.vlgmr.msra.gmra.mxu3 %v316_v8  ;;  %v238_v10 = vpop.f32.mrf.mxu2 }
  0xab   :  { %v251_v11 = vpop.f32.mrf.mxu3 }
  0xac   :  { %v262_v13 = vpop.f32.mrf.mxu0 }
  0xad   :  { %v263_v14 = vadd.f32 %v262_v13, %v105_v9 }
  0xae   :  { %v275_v15 = vpop.f32.mrf.mxu1 }
  0xaf   :  { %v309_v16 = vmax.f32 %v263_v14, 0.0  ;;  %v276_v17 = vadd.f32 %v275_v15, %v106_v12 }
  0xb1   :  { %v317_v20 = vpack.c.bf16 %v309_v16, %v309_v16  ;;  %v310_v21 = vmax.f32 %v276_v17, 0.0 }
  0xb2   :  { %v288_v23 = vpop.f32.mrf.mxu2 }
  0xb3   :  { %v318_v22 = vpack.c.bf16 %v310_v21, %v310_v21  ;;  %v301_v24 = vpop.f32.mrf.mxu3  ;;  %897 = vmatmul.bf16.vlgmr.msrb.gmra.mxu0 %v317_v20  ;;  %v289_v25 = vadd.f32 %v288_v23, %v107_v18 }
  0xb4   :  { %v302_v26 = vadd.f32 %v301_v24, %v108_v19  ;;  %v264_v27 = vpop.f32.mrf.mxu0 }
  0xb5   :  { %910 = vmatmul.bf16.vlgmr.msrb.gmra.mxu1 %v318_v22  ;;  %v311_v28 = vmax.f32 %v289_v25, 0.0 }
  0xb6   :  { %v312_v29 = vmax.f32 %v302_v26, 0.0  ;;  %v277_v30 = vpop.f32.mrf.mxu1 }
  0xb7   :  { %v319_v31 = vpack.c.bf16 %v311_v28, %v311_v28 }
  0xb8   :  { %v320_v32 = vpack.c.bf16 %v312_v29, %v312_v29 }
  0xb9   :  { %923 = vmatmul.bf16.vlgmr.msrb.gmra.mxu2 %v319_v31 }
  0xba   :  { %936 = vmatmul.bf16.vlgmr.msrb.gmra.mxu3 %v320_v32  ;;  %v290_v33 = vpop.f32.mrf.mxu2 }
  0xbb   :  { %v303_v34 = vpop.f32.mrf.mxu3 }
 0x120   :  { %v846_v35 = vpop.f32.mrf.mxu0 }
 0x121   :  { %v847_v38 = vadd.f32 %v1387_v37, %v846_v35 }
 0x122   :  { %v859_v36 = vpop.f32.mrf.mxu1 }
 0x123   :  { %v860_v41 = vadd.f32 %v859_v36, %v847_v38 }
 0x128   :  { %v848_v39 = vpop.f32.mrf.mxu0 }
 0x12a   :  { %v861_v40 = vpop.f32.mrf.mxu1 }
 0x12c   :  { %v872_v42 = vpop.f32.mrf.mxu2 }
 0x12d   :  { %v885_v43 = vpop.f32.mrf.mxu3  ;;  %v873_v44 = vadd.f32 %v872_v42, %v860_v41 }
 0x12f   :  { %v886_v47 = vadd.f32 %v885_v43, %v873_v44 }
 0x130   :  { %v898_v45 = vpop.f32.mrf.mxu0 }
 0x131   :  { %v899_v50 = vadd.f32 %v898_v45, %v886_v47 }
 0x132   :  { %v911_v46 = vpop.f32.mrf.mxu1 }
 0x133   :  { %v912_v53 = vadd.f32 %v911_v46, %v899_v50 }
 0x134   :  { %v874_v48 = vpop.f32.mrf.mxu2 }
 0x135   :  { %v887_v49 = vpop.f32.mrf.mxu3 }
 0x138   :  { %v900_v51 = vpop.f32.mrf.mxu0 }
 0x13a   :  { %v913_v52 = vpop.f32.mrf.mxu1 }
 0x13c   :  { %v924_v54 = vpop.f32.mrf.mxu2 }
 0x13d   :  { %v937_v55 = vpop.f32.mrf.mxu3  ;;  %v925_v56 = vadd.f32 %v924_v54, %v912_v53 }
 0x13f   :  { %v938_v57 = vadd.f32 %v937_v55, %v925_v56 }
 0x141   :  { %941 = vmax.xlane.f32.xlu0 %v938_v57 }
 0x144   :  { %v926_v58 = vpop.f32.mrf.mxu2 }
 0x145   :  { %v939_v59 = vpop.f32.mrf.mxu3 }
 0x1b4   :  { %v942_v60 = vpop.xlane.xlu0 %941 }
 0x1b5   :  { %v943_v61 = vsub.f32 %v938_v57, %v942_v60 }
 0x1b7   :  { %v944_v62 = vmul.f32 1.442695, %v943_v61 }
 0x1b9   :  { %1388 = vpow2.f32 %v944_v62 }
 0x1bf   :  { %v1389_v63 = vpop.eup %1388 }
 0x1c0   :  { %946 = vadd.xlane.f32.xlu0 %v1389_v63 }
 0x233   :  { %v947_v0 = vpop.xlane.xlu0 %946 }
 0x234   :  { %1390 = vrcp.f32 %v947_v0 }
 0x23a   :  { %v1391_v1 = vpop.eup %1390 }
 0x23b   :  { %v949_v2 = vmul.f32 %v1391_v1, %v1389_v63 }
 0x23d   :  { %950 = vst [vmem:[#allocation10] sm:$0xff] %v949_v2 }
 0x23e   :  { %961 = dma.vmem_to_hbm [thread:$0]  %s957_s15, 128, %s959_s18, [#allocation4]  }
 0x23f   :  { %1518 = dma.done.wait [#allocation4], 128  }
 0x240   :  { %1519 = vsyncadd [#allocation4], 4294967168 }
 0x241   :  { %966 = vsyncpa [#allocation3], 1 }
 0x242   :  { %967 = vsyncpa [#allocation6], 1 }
 0x243   :  { %968 = vsyncpa [#allocation9], 1 }
 0x244   :  { %969 = vsyncpa [#allocation4], 1 }

</bundles_post_ra>
